<compile_context>
chip_gen: v7x
topology: tpu7x:2x2x1
jax: 0.10.0
libtpu: 0.0.40
codegen_flags: <defaults>
</compile_context>

<pallas_src>
import functools

import jax
import jax.numpy as jnp
import numpy as np
from jax.experimental import pallas as pl
from jax.experimental.pallas import tpu as pltpu

# ----- synthetic FrankenPotential hyper-parameters (the registered buffers) ---
Z_SPECIES = 8          # len(model.gnn.base_model.atomic_numbers)
HIDDEN = 32            # random-feature / head width
R_MAX = 4.0            # model.gnn.base_model.r_max  (compile-time constant)
NUM_INTERACTIONS = 2   # model.gnn.base_model.num_interactions (unused in fwd)

_LANE = 128            # edge axis is padded/tiled in multiples of the lane width
_MAX_TILE_E = 2048     # per-step edge tile; 7 f32/edge * 2048 * 2 bufs << 32 MiB


def _round_up(x, m):
    return ((x + m - 1) // m) * m


# --------------------------- Pallas edge kernel -------------------------------
def _edge_kernel(csum_ref, d_ref, c_ref, esum_ref, g_ref, *, inv_rmax2):
    """One edge tile: per-edge energy + dE/dd, scalar energy accumulation.

    Layout is lane-dense: d_ref/g_ref are (3, TILE_E), c_ref is (1, TILE_E).
    esum_ref is a (1,1) accumulator resident across the whole grid (constant
    block index); it is seeded with the per-atom self-energy sum at step 0.
    """
    i = pl.program_id(0)

    @pl.when(i == 0)
    def _init():
        esum_ref[...] = csum_ref[...]          # seed with sum_i c_i

    d = d_ref[...]                             # (3, T)
    c = c_ref[...]                             # (1, T)
    dx = d[0:1, :]
    dy = d[1:2, :]
    dz = d[2:3, :]
    r2 = dx * dx + dy * dy + dz * dz           # (1, T)  pure VPU
    e = c * jnp.exp(-r2 * inv_rmax2)           # (1, T)  EUP exp
    g_ref[...] = (-2.0 * inv_rmax2) * (e * d)  # (3, T)  full-lane store
    esum_ref[...] += jnp.sum(e, keepdims=True)  # (1, 1)


def fused_edge_energy(d_t, c_recv_row, c_sum, r_max):
    """d_t: (3, E_pad) f32, c_recv_row: (1, E_pad) f32, c_sum: (1,1) f32.

    Returns (total_energy (1,1), g (3, E_pad)) where g = dE/dd per edge.
    """
    e_pad = d_t.shape[1]
    tile_e = min(_MAX_TILE_E, e_pad)
    assert e_pad % tile_e == 0 and tile_e % _LANE == 0
    num_tiles = e_pad // tile_e

    kern = functools.partial(_edge_kernel, inv_rmax2=1.0 / (r_max * r_max))
    cost = pl.CostEstimate(
        flops=10 * e_pad,
        transcendentals=e_pad,
        bytes_accessed=7 * 4 * e_pad + 8,      # (3+1) f32 in + 3 f32 out per edge
    )
    return pl.pallas_call(
        kern,
        grid=(num_tiles,),
        out_shape=(jax.ShapeDtypeStruct((1, 1), jnp.float32),
                   jax.ShapeDtypeStruct((3, e_pad), jnp.float32)),
        in_specs=[pl.BlockSpec((1, 1), lambda i: (0, 0)),        # c_sum seed
                  pl.BlockSpec((3, tile_e), lambda i: (0, i)),   # d tile
                  pl.BlockSpec((1, tile_e), lambda i: (0, i))],  # c_recv tile
        out_specs=(pl.BlockSpec((1, 1), lambda i: (0, 0)),       # energy accum
                   pl.BlockSpec((3, tile_e), lambda i: (0, i))), # g tile
        compiler_params=pltpu.CompilerParams(
            dimension_semantics=("arbitrary",)),                 # reduction axis
        cost_estimate=cost,
    )(c_sum, d_t, c_recv_row)


# ------------------------------ forward pass ----------------------------------
def lammps_franken_forward(params, data, local_or_ghost, compute_virials=False):
    node_attrs = data["node_attrs"].astype(jnp.float32)   # (N, Z) one-hot
    positions = data["positions"].astype(jnp.float32)     # (N, 3)
    edge_index = data["edge_index"]                        # (2, E) int32
    shifts = data["shifts"].astype(jnp.float32)            # (E, 3)
    del local_or_ghost                                      # unused (as in torch fwd)
    n_atoms = node_attrs.shape[0]
    n_edges = edge_index.shape[1]

    # atom_nums = torch.nonzero(node_attrs)[:, 1] + 1  (one-hot rows)
    atom_nums = jnp.argmax(node_attrs, axis=1).astype(jnp.int32) + 1
    _ = atom_nums  # carried into Configuration in the torch code

    # ---- per-atom head folded to a single (Z, 1) weight: c = A @ (W_emb @ w_head)
    w_eff = params["w_emb"] @ params["w_head"]              # (Z, 1), ~512 flops
    c = (node_attrs @ w_eff)[:, 0]                          # (N,)
    c_sum = jnp.sum(c).reshape(1, 1)                        # (1, 1)

    # glue gathers (data-dependent indexing)
    senders, receivers = edge_index[0], edge_index[1]
    # TODO(synk): the per-edge position/c gathers could be fused into the kernel
    # via scalar-prefetched edge indices; kept in XLA glue here.
    d_t = (positions[senders] - positions[receivers] + shifts).T   # (3, E) lane-dense
    c_recv = c[receivers][None, :]                                 # (1, E) lane-dense

    # pad the edge axis to a tile multiple; padded edges have c=0 => e=0, g=0
    tile_e = min(_MAX_TILE_E, _round_up(max(n_edges, 1), _LANE))
    e_pad = _round_up(max(n_edges, 1), tile_e)
    d_pad = jnp.pad(d_t, ((0, 0), (0, e_pad - n_edges)))
    c_pad = jnp.pad(c_recv, ((0, 0), (0, e_pad - n_edges)))

    # ---- fused Pallas kernel: total energy + per-edge position gradients ----
    e_total, g_t = fused_edge_energy(d_pad, c_pad, c_sum, R_MAX)   # (1,1), (3,E_pad)

    energy = e_total.reshape((1,))                                 # (1,)
    g_edge = g_t[:, :n_edges].T                                    # (E, 3)

    # forces = -dE/dpos
    # TODO(synk): XLA scatter-add kept for the force accumulation; a Pallas
    # segment-sum over edges bucketed by atom would avoid it for large E.
    grad_pos = jnp.zeros_like(positions)
    grad_pos = grad_pos.at[senders].add(g_edge)
    grad_pos = grad_pos.at[receivers].add(-g_edge)
    forces = -grad_pos                                             # (N, 3)

    # node_energy = energy.repeat(N) / N
    node_energy = jnp.repeat(energy, n_atoms) / n_atoms            # (N,)

    # spec: virials = torch.zeros((1, 3, 3)) when compute_virials=True
    virials = jnp.zeros((1, 3, 3), forces.dtype) if compute_virials else None
    return {"total_energy_local": energy,
            "node_energy": node_energy,
            "forces": forces,
            "virials": virials}


# pure-JAX reference for correctness check of the kernel
def _reference(params, data):
    a = data["node_attrs"].astype(jnp.float32)
    pos = data["positions"].astype(jnp.float32)
    s, r = data["edge_index"][0], data["edge_index"][1]
    c = (a @ params["w_emb"]) @ params["w_head"]
    d = pos[s] - pos[r] + data["shifts"]
    e = c[r] * jnp.exp(-jnp.sum(d * d, -1, keepdims=True) / (R_MAX ** 2))
    energy = jnp.sum(e) + jnp.sum(c)
    g = (-2.0 / R_MAX ** 2) * e * d
    grad = jnp.zeros_like(pos).at[s].add(g).at[r].add(-g)
    return energy.reshape((1,)), -grad


if __name__ == "__main__":
    key = jax.random.PRNGKey(0)
    k_emb, k_head, k_sp, k_pos, k_ei, k_sh = jax.random.split(key, 6)

    N, E = 16, 32
    params = {
        "w_emb": (jax.random.normal(k_emb, (Z_SPECIES, HIDDEN), jnp.float32) * 0.1),
        "w_head": (jax.random.normal(k_head, (HIDDEN, 1), jnp.float32) * 0.1),
    }

    species = jax.random.randint(k_sp, (N,), 0, Z_SPECIES)
    data = {
        "node_attrs": jax.nn.one_hot(species, Z_SPECIES, dtype=jnp.float32),
        "positions": jax.random.normal(k_pos, (N, 3), jnp.float32) * 2.0,
        "edge_index": jax.random.randint(k_ei, (2, E), 0, N).astype(jnp.int32),
        "shifts": jax.random.normal(k_sh, (E, 3), jnp.float32) * 0.1,
        "unit_shifts": jnp.zeros((E, 3), jnp.float32),
    }
    local_or_ghost = jnp.ones((N,), jnp.int32)

    out = lammps_franken_forward(params, data, local_or_ghost, compute_virials=True)
    jax.block_until_ready(out["forces"])
    jax.block_until_ready(out["total_energy_local"])

    ref_e, ref_f = _reference(params, data)
    assert np.allclose(np.asarray(out["total_energy_local"]), np.asarray(ref_e),
                       rtol=1e-5, atol=1e-5)
    assert np.allclose(np.asarray(out["forces"]), np.asarray(ref_f),
                       rtol=1e-5, atol=1e-5)
    assert out["node_energy"].shape == (N,)
    assert out["virials"].shape == (1, 3, 3)

    print("KERNEL_OK")
</pallas_src>

<mosaic_0001>
module attributes {stable_mosaic.version = 11 : i64} {
  func.func @_edge_kernel(%arg0: i32, %arg1: memref<1x1xf32, #tpu.memory_space<vmem>>, %arg2: memref<3x128xf32, #tpu.memory_space<vmem>>, %arg3: memref<1x128xf32, #tpu.memory_space<vmem>>, %arg4: memref<1x1xf32, #tpu.memory_space<vmem>>, %arg5: memref<3x128xf32, #tpu.memory_space<vmem>>) attributes {dimension_semantics = [#tpu.dimension_semantics<arbitrary>], iteration_bounds = array<i64: 1>, scalar_prefetch = 0 : i64, scratch_operands = 0 : i64, tpu.core_type = #tpu.core_type<tc>, window_params = [{pipeline_mode = #tpu.pipeline_mode<synchronous>, transform_indices = @transform_0, window_bounds = array<i64: 1, 1>}, {transform_indices = @transform_1, window_bounds = array<i64: 3, 128>}, {transform_indices = @transform_2, window_bounds = array<i64: 1, 128>}, {pipeline_mode = #tpu.pipeline_mode<synchronous>, transform_indices = @transform_3, window_bounds = array<i64: 1, 1>}, {transform_indices = @transform_4, window_bounds = array<i64: 3, 128>}]} {
    %c0_i32 = arith.constant 0 : i32
    %0 = arith.cmpi eq, %arg0, %c0_i32 : i32
    %1 = arith.extui %0 : i1 to i32
    %c0_i32_0 = arith.constant 0 : i32
    %2 = arith.cmpi ne, %1, %c0_i32_0 : i32
    scf.if %2 {
      %c0_13 = arith.constant 0 : index
      %c0_14 = arith.constant 0 : index
      %32 = vector.load %arg1[%c0_13, %c0_14] : memref<1x1xf32, #tpu.memory_space<vmem>>, vector<1x1xf32>
      %c0_15 = arith.constant 0 : index
      %c0_16 = arith.constant 0 : index
      %33 = vector.load %arg4[%c0_15, %c0_16] : memref<1x1xf32, #tpu.memory_space<vmem>>, vector<1x1xf32>
      tpu.vector_store %arg4[%c0_15, %c0_16], %32 {strides = array<i32>} : memref<1x1xf32, #tpu.memory_space<vmem>>, vector<1x1xf32>,
    } else {
    }
    %c0 = arith.constant 0 : index
    %c0_1 = arith.constant 0 : index
    %3 = vector.load %arg2[%c0, %c0_1] : memref<3x128xf32, #tpu.memory_space<vmem>>, vector<3x128xf32>
    %c0_2 = arith.constant 0 : index
    %c0_3 = arith.constant 0 : index
    %4 = vector.load %arg3[%c0_2, %c0_3] : memref<1x128xf32, #tpu.memory_space<vmem>>, vector<1x128xf32>
    %5 = vector.extract_strided_slice %3 {offsets = [0, 0], sizes = [1, 128], strides = [1, 1]} : vector<3x128xf32> to vector<1x128xf32>
    %6 = vector.extract_strided_slice %3 {offsets = [1, 0], sizes = [1, 128], strides = [1, 1]} : vector<3x128xf32> to vector<1x128xf32>
    %7 = vector.extract_strided_slice %3 {offsets = [2, 0], sizes = [1, 128], strides = [1, 1]} : vector<3x128xf32> to vector<1x128xf32>
    %8 = arith.mulf %5, %5 : vector<1x128xf32>
    %9 = arith.mulf %6, %6 : vector<1x128xf32>
    %10 = arith.addf %8, %9 : vector<1x128xf32>
    %11 = arith.mulf %7, %7 : vector<1x128xf32>
    %12 = arith.addf %10, %11 : vector<1x128xf32>
    %cst = arith.constant 0.000000e+00 : f32
    %13 = vector.broadcast %cst : f32 to vector<1x128xf32>
    %14 = arith.subf %13, %12 : vector<1x128xf32>
    %cst_4 = arith.constant 6.250000e-02 : f32
    %15 = vector.broadcast %cst_4 : f32 to vector<1x128xf32>
    %16 = arith.mulf %14, %15 : vector<1x128xf32>
    %17 = math.exp %16 : vector<1x128xf32>
    %18 = arith.mulf %4, %17 : vector<1x128xf32>
    %19 = vector.broadcast %18 : vector<1x128xf32> to vector<3x128xf32>
    %20 = arith.mulf %19, %3 : vector<3x128xf32>
    %cst_5 = arith.constant -1.250000e-01 : f32
    %21 = vector.broadcast %cst_5 : f32 to vector<3x128xf32>
    %22 = arith.mulf %21, %20 : vector<3x128xf32>
    %c0_6 = arith.constant 0 : index
    %c0_7 = arith.constant 0 : index
    %23 = vector.load %arg5[%c0_6, %c0_7] : memref<3x128xf32, #tpu.memory_space<vmem>>, vector<3x128xf32>
    tpu.vector_store %arg5[%c0_6, %c0_7], %22 {strides = array<i32>} : memref<3x128xf32, #tpu.memory_space<vmem>>, vector<3x128xf32>,
    %c0_8 = arith.constant 0 : index
    %c0_9 = arith.constant 0 : index
    %24 = vector.load %arg4[%c0_8, %c0_9] : memref<1x1xf32, #tpu.memory_space<vmem>>, vector<1x1xf32>
    %25 = vector.shape_cast %18 : vector<1x128xf32> to vector<1x1x128xf32>
    %cst_10 = arith.constant dense<0.000000e+00> : vector<1xf32>
    %26 = vector.multi_reduction <add>, %25, %cst_10 [1, 2] : vector<1x1x128xf32> to vector<1xf32>
    %27 = vector.shape_cast %26 : vector<1xf32> to vector<1x1x1xf32>
    %28 = vector.extract %27[0, 0, 0] : f32 from vector<1x1x1xf32>
    %29 = vector.broadcast %28 : f32 to vector<1x1xf32>
    %30 = arith.addf %24, %29 : vector<1x1xf32>
    %c0_11 = arith.constant 0 : index
    %c0_12 = arith.constant 0 : index
    %31 = vector.load %arg4[%c0_11, %c0_12] : memref<1x1xf32, #tpu.memory_space<vmem>>, vector<1x1xf32>
    tpu.vector_store %arg4[%c0_11, %c0_12], %30 {strides = array<i32>} : memref<1x1xf32, #tpu.memory_space<vmem>>, vector<1x1xf32>,
    return
  }
  func.func @transform_0(%arg0: i32) -> (i32, i32) {
    %c0_i32 = arith.constant 0 : i32
    %c0_i32_0 = arith.constant 0 : i32
    %c0_i32_1 = arith.constant 0 : i32
    return %c0_i32, %c0_i32_0 : i32, i32
  }
  func.func @transform_1(%arg0: i32) -> (i32, i32) {
    %c0_i32 = arith.constant 0 : i32
    %c0_i32_0 = arith.constant 0 : i32
    return %c0_i32, %arg0 : i32, i32
  }
  func.func @transform_2(%arg0: i32) -> (i32, i32) {
    %c0_i32 = arith.constant 0 : i32
    %c0_i32_0 = arith.constant 0 : i32
    return %c0_i32, %arg0 : i32, i32
  }
  func.func @transform_3(%arg0: i32) -> (i32, i32) {
    %c0_i32 = arith.constant 0 : i32
    %c0_i32_0 = arith.constant 0 : i32
    %c0_i32_1 = arith.constant 0 : i32
    return %c0_i32, %c0_i32_0 : i32, i32
  }
  func.func @transform_4(%arg0: i32) -> (i32, i32) {
    %c0_i32 = arith.constant 0 : i32
    %c0_i32_0 = arith.constant 0 : i32
    return %c0_i32, %arg0 : i32, i32
  }
}

</mosaic_0001>

<bundles_post_ra>
// kernel: tpu_custom_call.1
= control target key start
LH: loop header
LB: loop body
LE: loop exit
PB: predicated region body
PF: predicated region fallthrough
CT: control target
= control target key end

     0   :  { %s259_s0 = inlined_call_operand.<no memory space> [shape: f32[1,1], index: 0, kind: input, shape index: {}]   ;;  %s260_s1 = inlined_call_operand.hbm [shape: f32[3,128], index: 1, kind: input, shape index: {}]   ;;  %s261_s2 = inlined_call_operand.vmem [shape: f32[1,128], index: 2, kind: input, shape index: {}]   ;;  %s262_s3 = inlined_call_operand.hbm [shape: f32[1,1], index: 3, kind: output, shape index: {0}]   ;;  %s263_s4 = inlined_call_operand.hbm [shape: f32[3,128], index: 4, kind: output, shape index: {1}]  }
   0x1   :  { %v10_v0 = vstv %s259_s0 }
   0x2   :  { %11 = vst [vmem:[#allocation2] sm:$0x1] %v10_v0 }
   0x3   :  { %12 = vsyncpa [#allocation4], 0 }
   0x4   :  { %13 = vsyncpa [#allocation5], 0 }
   0x5   :  { %14 = vsyncpa [#allocation8], 0  ;;  %s187_s17 = smov [#allocation3]   ;;  %s115_s21 = scalar_lea.hbm %s260_s1, 64 }
   0x6   :  { %s23_s18 = sshll.u32 %s187_s17, 4  ;;  %p116_p0 = scmp.ne.s32.totalorder %s260_s1, %s115_s21  ;;  %s24_s18 = int_to_ptr.vmem [resolvable:$true] %s23_s18 }
   0x7   :  { %p119_p1 = scmp.lt.u32.totalorder %s115_s21, %s260_s1 }
   0x9   :  { %p121_p2 = pnand %p119_p1, %p116_p0 }
   0xb   :  { %124 = shalt.err (!%p121_p2)
}
   0xc   :  { %s125_s0 = scalar_lea.vmem %s24_s18, 64  ;;  %p130_p4 = scmp.lt.s32.totalorder %s24_s18, %s24_s18 }
   0xd   :  { %p126_p3 = scmp.ne.s32.totalorder %s24_s18, %s125_s0  ;;  %p131_p5 = scmp.lt.s32.totalorder %s125_s0, %s125_s0 }
   0xf   :  { %p132_p6 = por %p131_p5, %p130_p4 }
  0x11   :  { %p133_p7 = pnand %p132_p6, %p126_p3 }
  0x13   :  { %136 = shalt.err (!%p133_p7)
}
  0x14   :  { %26 = dma.hbm_to_vmem [thread:$0]  %s260_s1, 64, %s24_s18, [#allocation4]  }
  0x15   :  { %181 = dma.done.wait [#allocation4], 64  }
  0x16   :  { %182 = vsyncadd [#allocation4], 4294967232  ;;  %vm37_vm0 = vcmask 0   ;;  %v36_v1 = vld [vmem:[#allocation2] sm:$0x1]  ;;  %vm64_vm1 = vcmask 1040384   ;;  %v55_v15 = vlaneseq }
  0x17   :  { %v39_v2 = vld [vmem:[#allocation3] sm:$0x7]  ;;  %38 = vst.msk [vmem:[#allocation6] sm:$0x1] %vm37_vm0, %v36_v1  ;;  %v40_v11 = vld [vmem:[%s261_s2] sm:$0x1] }
  0x18   :  { %v41_v3 = vmul.f32 %v39_v2, %v39_v2  ;;  %v56_v16 = vshrl.u32 %v55_v15, 7  ;;  %s188_s1 = smov [#allocation7]  }
  0x19   :  { %s95_s30 = sshll.u32 %s188_s1, 4  ;;  %s96_s30 = int_to_ptr.vmem [resolvable:$true] %s95_s30 }
  0x1a   :  { %v43_v4 = vrot.slane %v41_v3, 1  ;;  %v46_v5 = vrot.slane %v41_v3, 2  ;;  %v57_v17 = vsub.s32 0, %v56_v16  ;;  %s137_s5 = scalar_lea.vmem %s96_s30, 64  ;;  %p142_p9 = scmp.lt.s32.totalorder %s96_s30, %s96_s30 }
  0x1b   :  { %p138_p8 = scmp.ne.s32.totalorder %s96_s30, %s137_s5  ;;  %p143_p10 = scmp.lt.s32.totalorder %s137_s5, %s137_s5 }
  0x1c   :  { %v45_v6 = vadd.f32 %v43_v4, %v41_v3 }
  0x1d   :  { %p144_p11 = por %p143_p10, %p142_p9 }
  0x1e   :  { %v48_v7 = vadd.f32 %v46_v5, %v45_v6 }
  0x1f   :  { %p145_p12 = pnand %p144_p11, %p138_p8 }
  0x20   :  { %v49_v8 = vsub.f32 0.0, %v48_v7 }
  0x22   :  { %v50_v9 = vmul.f32 0.0625, %v49_v8 }
  0x24   :  { %v51_v10 = vmul.f32 1.442695, %v50_v9 }
  0x26   :  { %113 = vpow2.f32 %v51_v10 }
  0x30   :  { %v114_v12 = vpop.eup %113 }
  0x31   :  { %v53_v13 = vmul.f32 %v114_v12, %v40_v11 }
  0x33   :  { %v65_v14 = vsel %vm64_vm1, %v53_v13, 0.0  ;;  %v58_v18 = vrot.slane %v53_v13, %v57_v17 }
  0x34   :  { %66 = vadd.xlane.f32.xlu0 %v65_v14 }
  0x35   :  { %v60_v19 = vmul.f32 %v58_v18, %v39_v2 }
  0x37   :  { %v61_v20 = vmul.f32 -0.125, %v60_v19 }
  0x39   :  { %62 = vst [vmem:[#allocation7] sm:$0x7] %v61_v20 }
  0x3a   :  { %148 = shalt.err (!%p145_p12)
}
  0x3b   :  { %s149_s7 = scalar_lea.hbm %s263_s4, 64 }
  0x3c   :  { %p150_p13 = scmp.ne.s32.totalorder %s263_s4, %s149_s7  ;;  %p153_p0 = scmp.lt.u32.totalorder %s149_s7, %s263_s4 }
  0x3e   :  { %p155_p1 = pnand %p153_p0, %p150_p13 }
  0x40   :  { %158 = shalt.err (!%p155_p1)
}
  0x41   :  { %98 = dma.vmem_to_hbm [thread:$0]  %s96_s30, 64, %s263_s4, [#allocation8]   ;;  %v63_v28 = vld [vmem:[#allocation6] sm:$0x1] }
  0x42   :  { %s189_s14 = smov [#allocation6]  }
  0x43   :  { %s85_s15 = sshll.u32 %s189_s14, 4  ;;  %s86_s15 = int_to_ptr.vmem [resolvable:$true] %s85_s15 }
  0x44   :  { %s159_s17 = scalar_lea.vmem %s86_s15, 16  ;;  %s163_s4 = scalar_lea.vmem %s86_s15, 32 }
  0x45   :  { %p160_p2 = scmp.ne.s32.totalorder %s86_s15, %s159_s17  ;;  %p164_p3 = scmp.lt.s32.totalorder %s86_s15, %s86_s15 }
  0x46   :  { %p165_p4 = scmp.lt.s32.totalorder %s163_s4, %s159_s17 }
  0x48   :  { %p166_p5 = por %p165_p4, %p164_p3 }
  0x4a   :  { %p167_p6 = pnand %p166_p5, %p160_p2 }
  0xc1   :  { %v67_v21 = vpop.xlane.xlu0 %66 }
  0xc2   :  { %v68_v22 = vrot.slane %v67_v21, 4 }
  0xc4   :  { %v69_v23 = vadd.f32 %v68_v22, %v67_v21 }
  0xc6   :  { %v70_v24 = vrot.slane %v69_v23, 2 }
  0xc8   :  { %v71_v25 = vadd.f32 %v70_v24, %v69_v23 }
  0xca   :  { %v72_v26 = vrot.slane %v71_v25, 1 }
  0xcc   :  { %v73_v27 = vadd.f32 %v72_v26, %v71_v25 }
  0xce   :  { %108 = vpush %v73_v27 }
  0xff   :  { %s109_s16 = spop %108 }
 0x100   :  { %v75_v29 = vstv %s109_s16 }
 0x101   :  { %v76_v30 = vadd.f32 %v75_v29, %v63_v28 }
 0x103   :  { %78 = vst.msk [vmem:[#allocation6] sm:$0x1] %vm37_vm0, %v76_v30 }
 0x104   :  { %170 = shalt.err (!%p167_p6)
}
 0x105   :  { %s171_s20 = scalar_lea.hbm %s262_s3, 16 }
 0x106   :  { %p172_p7 = scmp.ne.s32.totalorder %s262_s3, %s171_s20  ;;  %p175_p8 = scmp.lt.u32.totalorder %s171_s20, %s262_s3 }
 0x108   :  { %p177_p9 = pnand %p175_p8, %p172_p7 }
 0x10a   :  { %180 = shalt.err (!%p177_p9)
}
 0x10b   :  { %88 = dma.vmem_to_hbm [thread:$0]  %s86_s15, 16, %s262_s3, [#allocation5]  }
 0x10c   :  { %183 = dma.done.wait [#allocation5], 16  }
 0x10d   :  { %184 = vsyncadd [#allocation5], 4294967280 }
 0x10e   :  { %185 = dma.done.wait [#allocation8], 64  }
 0x10f   :  { %186 = vsyncadd [#allocation8], 4294967232 }
 0x110   :  { %105 = vsyncpa [#allocation4], 1 }
 0x111   :  { %106 = vsyncpa [#allocation5], 1 }
 0x112   :  { %107 = vsyncpa [#allocation8], 1 }

</bundles_post_ra>
